<compile_context>
chip_gen: v7x
topology: tpu7x:2x2x1
jax: 0.10.0
libtpu: 0.0.40
codegen_flags: <defaults>
</compile_context>

<pallas_src>
import jax
import jax.numpy as jnp
from jax.experimental import pallas as pl
from jax.experimental.pallas import tpu as pltpu


# -----------------------------------------------------------------------------
# Parameter preparation — call ONCE, outside any recurrent loop.
# -----------------------------------------------------------------------------
def prepare_lstm_cell_params(weight_ih, bias_ih, weight_hh, bias_hh,
                             matmul_dtype=None):
    """Transpose / reorder / fuse the LSTM parameters once.

    weight_ih: (4H, I), weight_hh: (4H, H), bias_*: (4H,)  (torch gate order
    [i, f, c, o] along the leading dim, as in the reference module).

    Returns:
      w_ih_t : (I, 4H)  columns reordered to [i, f, o, c]
      w_hh_t : (H, 4H)  columns reordered to [i, f, o, c]
      b_fused: (1, 4H)  f32, b_ih + b_hh, same column order
    """
    G = weight_ih.shape[0]
    H = G // 4
    # torch gate order [i, f, c, o] -> [i, f, o, c]: the three sigmoid gates
    # become contiguous lanes 0:3H, tanh gate is 3H:4H.
    perm = jnp.concatenate([jnp.arange(0, 2 * H),
                            jnp.arange(3 * H, 4 * H),
                            jnp.arange(2 * H, 3 * H)])
    w_ih_t = jnp.transpose(weight_ih[perm])          # (I, 4H)
    w_hh_t = jnp.transpose(weight_hh[perm])          # (H, 4H)
    b_fused = (bias_ih.astype(jnp.float32)
               + bias_hh.astype(jnp.float32))[perm].reshape(1, G)
    if matmul_dtype is not None:
        # Matmul operand dtype only; accumulation and gate math stay f32.
        w_ih_t = w_ih_t.astype(matmul_dtype)
        w_hh_t = w_hh_t.astype(matmul_dtype)
    return w_ih_t, w_hh_t, b_fused


# -----------------------------------------------------------------------------
# Single-step cell (the module's forward).
# -----------------------------------------------------------------------------
def _lstm_cell_kernel(x_ref, h_ref, c_ref, w_ih_ref, w_hh_ref, b_ref,
                      h_out_ref, c_out_ref):
    H = c_ref.shape[1]
    gates = (
        jnp.dot(x_ref[...].astype(w_ih_ref.dtype), w_ih_ref[...],
                preferred_element_type=jnp.float32)
        + jnp.dot(h_ref[...].astype(w_hh_ref.dtype), w_hh_ref[...],
                  preferred_element_type=jnp.float32)
        + b_ref[...])                                # (1, 4H) bcast over batch

    sig = jax.nn.sigmoid(gates[:, :3 * H])           # [i | f | o] contiguous
    g_i = sig[:, 0 * H:1 * H]
    g_f = sig[:, 1 * H:2 * H]
    g_o = sig[:, 2 * H:3 * H]
    g_c = jnp.tanh(gates[:, 3 * H:4 * H])

    c_out = g_f * c_ref[...].astype(jnp.float32) + g_i * g_c
    h_out = g_o * jnp.tanh(c_out)

    h_out_ref[...] = h_out.astype(h_out_ref.dtype)
    c_out_ref[...] = c_out.astype(c_out_ref.dtype)


def my_lstm_cell(x, h_in_c_in, w_ih_t, w_hh_t, b_fused):
    """Pallas implementation of MyLSTMCell.forward (single timestep).

    x: (B, I); h_in_c_in = (h_in, c_in) each (B, H).
    Returns (h_out, c_out) as float32 (cell state is kept in f32 regardless of
    the weight / input dtype).
    """
    h_in, c_in = h_in_c_in
    B, I = x.shape
    H = h_in.shape[1]
    G = 4 * H
    assert w_ih_t.shape == (I, G) and w_hh_t.shape == (H, G)
    assert b_fused.shape == (1, G)

    full = lambda shape: pl.BlockSpec(shape, lambda: (0,) * len(shape))

    h_out, c_out = pl.pallas_call(
        _lstm_cell_kernel,
        out_shape=(jax.ShapeDtypeStruct((B, H), jnp.float32),
                   jax.ShapeDtypeStruct((B, H), jnp.float32)),
        in_specs=[full((B, I)), full((B, H)), full((B, H)),
                  full((I, G)), full((H, G)), full((1, G))],
        out_specs=(full((B, H)), full((B, H))),
    )(x, h_in, c_in, w_ih_t, w_hh_t, b_fused)
    return h_out, c_out


# -----------------------------------------------------------------------------
# Sequence-fused recurrence: one pallas_call for all T steps.
# -----------------------------------------------------------------------------
def _lstm_seq_kernel(xproj_ref, w_hh_ref, h0_ref, c0_ref,
                     h_all_ref, c_all_ref, h_sc, c_sc):
    t = pl.program_id(0)
    H = c_sc.shape[1]

    @pl.when(t == 0)
    def _():
        h_sc[...] = h0_ref[...].astype(jnp.float32)
        c_sc[...] = c0_ref[...].astype(jnp.float32)

    # Only the recurrent matmul lives on the serial chain: (B, H) @ (H, 4H).
    # x @ W_ih^T + b_ih + b_hh was hoisted and streams in via xproj_ref.
    # Cast the matmul operand to the weight dtype; h/c themselves stay f32.
    gates = xproj_ref[0] + jnp.dot(h_sc[...].astype(w_hh_ref.dtype),
                                   w_hh_ref[...],
                                   preferred_element_type=jnp.float32)

    sig = jax.nn.sigmoid(gates[:, :3 * H])            # [i | f | o]
    g_i = sig[:, 0 * H:1 * H]
    g_f = sig[:, 1 * H:2 * H]
    g_o = sig[:, 2 * H:3 * H]
    g_c = jnp.tanh(gates[:, 3 * H:4 * H])

    c_new = g_f * c_sc[...] + g_i * g_c
    h_new = g_o * jnp.tanh(c_new)
    c_sc[...] = c_new
    h_sc[...] = h_new

    h_all_ref[0] = h_new.astype(h_all_ref.dtype)
    c_all_ref[0] = c_new.astype(c_all_ref.dtype)


def my_lstm_sequence(x_seq, h0, c0, w_ih_t, w_hh_t, b_fused):
    """Run MyLSTMCell over a full sequence in ONE pallas_call.

    x_seq: (T, B, I); h0/c0: (B, H).
    Returns (h_all, c_all), each (T, B, H) float32 (per-step outputs; the
    final state is h_all[-1], c_all[-1]).
    """
    T, B, I = x_seq.shape
    H = h0.shape[1]
    G = 4 * H

    # Pad the batch (sublane) dim to a multiple of 8 — B=2 would use only 2/8
    # sublanes of every vreg / MXU row. Padded rows are computed & discarded.
    Bp = max(8, -(-B // 8) * 8)
    if Bp != B:
        x_seq = jnp.pad(x_seq, ((0, 0), (0, Bp - B), (0, 0)))
        h0 = jnp.pad(h0, ((0, Bp - B), (0, 0)))
        c0 = jnp.pad(c0, ((0, Bp - B), (0, 0)))

    # Hoisted input projection: one big-M matmul over all T steps, outside the
    # serial recurrence (runs at MXU-efficient M = T*Bp).
    xproj = jnp.dot(x_seq.reshape(T * Bp, I).astype(w_ih_t.dtype), w_ih_t,
                    preferred_element_type=jnp.float32,
                    precision=jax.lax.Precision.HIGHEST)
    xproj = (xproj + b_fused).reshape(T, Bp, G).astype(jnp.float32)

    h_all, c_all = pl.pallas_call(
        _lstm_seq_kernel,
        out_shape=(jax.ShapeDtypeStruct((T, Bp, H), jnp.float32),
                   jax.ShapeDtypeStruct((T, Bp, H), jnp.float32)),
        grid_spec=pltpu.PrefetchScalarGridSpec(
            num_scalar_prefetch=0,
            grid=(T,),
            in_specs=[
                # streamed per time step (double-buffered by the pipeline)
                pl.BlockSpec((1, Bp, G), lambda t: (t, 0, 0)),
                # constant index_maps -> DMA'd once, VMEM-resident for all T
                pl.BlockSpec((H, G), lambda t: (0, 0)),
                pl.BlockSpec((Bp, H), lambda t: (0, 0)),
                pl.BlockSpec((Bp, H), lambda t: (0, 0)),
            ],
            out_specs=[
                pl.BlockSpec((1, Bp, H), lambda t: (t, 0, 0)),
                pl.BlockSpec((1, Bp, H), lambda t: (t, 0, 0)),
            ],
            scratch_shapes=[pltpu.VMEM((Bp, H), jnp.float32),   # h carry
                            pltpu.VMEM((Bp, H), jnp.float32)],  # c carry
        ),
        compiler_params=pltpu.CompilerParams(
            dimension_semantics=("arbitrary",)),   # time is serial
    )(xproj, w_hh_t, h0, c0)

    return h_all[:, :B, :], c_all[:, :B, :]


# -----------------------------------------------------------------------------
# Pure-JAX references mirroring the PyTorch forward exactly.
# -----------------------------------------------------------------------------
def _reference_cell(x, h_in, c_in, weight_ih, bias_ih, weight_hh, bias_hh):
    hp = jax.lax.Precision.HIGHEST
    result1 = jnp.dot(x, weight_ih.T, precision=hp) + bias_ih
    result2 = jnp.dot(h_in, weight_hh.T, precision=hp) + bias_hh
    gates = result1 + result2
    H = h_in.shape[1]
    gi = jax.nn.sigmoid(gates[:, 0 * H:1 * H])
    gf = jax.nn.sigmoid(gates[:, 1 * H:2 * H])
    gc = jnp.tanh(gates[:, 2 * H:3 * H])
    go = jax.nn.sigmoid(gates[:, 3 * H:4 * H])
    c_out = gf * c_in + gi * gc
    h_out = go * jnp.tanh(c_out)
    return h_out, c_out


def _reference_sequence(x_seq, h0, c0, *params):
    hs, cs = [], []
    h, c = h0, c0
    for t in range(x_seq.shape[0]):
        h, c = _reference_cell(x_seq[t], h, c, *params)
        hs.append(h)
        cs.append(c)
    return jnp.stack(hs), jnp.stack(cs)


# -----------------------------------------------------------------------------
if __name__ == "__main__":
    batch_size = 2
    input_size = 16
    hidden_size = 32
    seq_len = 8

    key = jax.random.PRNGKey(0)
    ks = jax.random.split(key, 8)

    x = jax.random.normal(ks[0], (batch_size, input_size), jnp.float32)
    h0 = jax.random.normal(ks[1], (batch_size, hidden_size), jnp.float32)
    c0 = jax.random.normal(ks[2], (batch_size, hidden_size), jnp.float32)
    weight_ih = jax.random.normal(ks[3], (4 * hidden_size, input_size), jnp.float32)
    bias_ih = jax.random.normal(ks[4], (4 * hidden_size,), jnp.float32)
    weight_hh = jax.random.normal(ks[5], (4 * hidden_size, hidden_size), jnp.float32)
    bias_hh = jax.random.normal(ks[6], (4 * hidden_size,), jnp.float32)
    x_seq = jax.random.normal(ks[7], (seq_len, batch_size, input_size), jnp.float32)

    # References.
    h_ref, c_ref = _reference_cell(x, h0, c0, weight_ih, bias_ih,
                                   weight_hh, bias_hh)
    h_seq_ref, c_seq_ref = _reference_sequence(x_seq, h0, c0, weight_ih,
                                               bias_ih, weight_hh, bias_hh)

    # --- single-step cell (f32), i.e. the module's forward ------------------
    w_ih_t, w_hh_t, b_fused = prepare_lstm_cell_params(weight_ih, bias_ih,
                                                       weight_hh, bias_hh)
    h_out, c_out = my_lstm_cell(x, (h0, c0), w_ih_t, w_hh_t, b_fused)
    jax.block_until_ready((h_out, c_out))
    assert jnp.allclose(h_out, h_ref, atol=1e-3, rtol=1e-3), "cell h mismatch"
    assert jnp.allclose(c_out, c_ref, atol=1e-3, rtol=1e-3), "cell c mismatch"

    # --- sequence-fused recurrence (f32) -------------------------------------
    h_all, c_all = my_lstm_sequence(x_seq, h0, c0, w_ih_t, w_hh_t, b_fused)
    jax.block_until_ready((h_all, c_all))
    assert jnp.allclose(h_all, h_seq_ref, atol=2e-3, rtol=2e-3), "seq h mismatch"
    assert jnp.allclose(c_all, c_seq_ref, atol=2e-3, rtol=2e-3), "seq c mismatch"

    # --- sequence with bf16 matmul operands (works on v5e/v6e/v7x) ----------
    # Error budget is bf16 quantization of the matmul operands accumulated
    # over T steps; h/c are still carried in f32.
    w_ih_bf, w_hh_bf, b_f32 = prepare_lstm_cell_params(
        weight_ih, bias_ih, weight_hh, bias_hh, matmul_dtype=jnp.bfloat16)
    h_bf, c_bf = my_lstm_sequence(x_seq, h0, c0, w_ih_bf, w_hh_bf, b_f32)
    jax.block_until_ready((h_bf, c_bf))
    assert jnp.allclose(h_bf, h_seq_ref, atol=0.5), "bf16 seq h diverged"
    assert jnp.allclose(c_bf, c_seq_ref, atol=0.5), "bf16 seq c diverged"

    print("KERNEL_OK")
</pallas_src>

<mosaic_0001>
module attributes {stable_mosaic.version = 11 : i64} {
  func.func @_lstm_cell_kernel(%arg0: memref<2x16xf32, #tpu.memory_space<vmem>>, %arg1: memref<2x32xf32, #tpu.memory_space<vmem>>, %arg2: memref<2x32xf32, #tpu.memory_space<vmem>>, %arg3: memref<16x128xf32, #tpu.memory_space<vmem>>, %arg4: memref<32x128xf32, #tpu.memory_space<vmem>>, %arg5: memref<1x128xf32, #tpu.memory_space<vmem>>, %arg6: memref<2x32xf32, #tpu.memory_space<vmem>>, %arg7: memref<2x32xf32, #tpu.memory_space<vmem>>) attributes {dimension_semantics = [], scalar_prefetch = 0 : i64, scratch_operands = 0 : i64, tpu.core_type = #tpu.core_type<tc>} {
    %c0 = arith.constant 0 : index
    %c0_0 = arith.constant 0 : index
    %0 = vector.load %arg0[%c0, %c0_0] : memref<2x16xf32, #tpu.memory_space<vmem>>, vector<2x16xf32>
    %c0_1 = arith.constant 0 : index
    %c0_2 = arith.constant 0 : index
    %1 = vector.load %arg3[%c0_1, %c0_2] : memref<16x128xf32, #tpu.memory_space<vmem>>, vector<16x128xf32>
    %cst = arith.constant dense<0.000000e+00> : vector<2x128xf32>
    %2 = tpu.matmul %0, %1, %cst {dimension_numbers = #tpu.dot_dimension_numbers<[1], [0], [0], [1], [0, 0, 1, 1], [], []>} : vector<2x16xf32>, vector<16x128xf32>, vector<2x128xf32> -> vector<2x128xf32>
    %c0_3 = arith.constant 0 : index
    %c0_4 = arith.constant 0 : index
    %3 = vector.load %arg1[%c0_3, %c0_4] : memref<2x32xf32, #tpu.memory_space<vmem>>, vector<2x32xf32>
    %c0_5 = arith.constant 0 : index
    %c0_6 = arith.constant 0 : index
    %4 = vector.load %arg4[%c0_5, %c0_6] : memref<32x128xf32, #tpu.memory_space<vmem>>, vector<32x128xf32>
    %cst_7 = arith.constant dense<0.000000e+00> : vector<2x128xf32>
    %5 = tpu.matmul %3, %4, %cst_7 {dimension_numbers = #tpu.dot_dimension_numbers<[1], [0], [0], [1], [0, 0, 1, 1], [], []>} : vector<2x32xf32>, vector<32x128xf32>, vector<2x128xf32> -> vector<2x128xf32>
    %6 = arith.addf %2, %5 : vector<2x128xf32>
    %c0_8 = arith.constant 0 : index
    %c0_9 = arith.constant 0 : index
    %7 = vector.load %arg5[%c0_8, %c0_9] : memref<1x128xf32, #tpu.memory_space<vmem>>, vector<1x128xf32>
    %8 = vector.broadcast %7 : vector<1x128xf32> to vector<2x128xf32>
    %9 = arith.addf %6, %8 : vector<2x128xf32>
    %10 = vector.extract_strided_slice %9 {offsets = [0, 0], sizes = [2, 96], strides = [1, 1]} : vector<2x128xf32> to vector<2x96xf32>
    %11 = arith.negf %10 : vector<2x96xf32>
    %12 = math.exp %11 : vector<2x96xf32>
    %cst_10 = arith.constant 1.000000e+00 : f32
    %13 = vector.broadcast %cst_10 : f32 to vector<2x96xf32>
    %14 = arith.addf %13, %12 : vector<2x96xf32>
    %15 = arith.divf %13, %14 : vector<2x96xf32>
    %16 = vector.extract_strided_slice %15 {offsets = [0, 0], sizes = [2, 32], strides = [1, 1]} : vector<2x96xf32> to vector<2x32xf32>
    %17 = vector.extract_strided_slice %15 {offsets = [0, 32], sizes = [2, 32], strides = [1, 1]} : vector<2x96xf32> to vector<2x32xf32>
    %18 = vector.extract_strided_slice %15 {offsets = [0, 64], sizes = [2, 32], strides = [1, 1]} : vector<2x96xf32> to vector<2x32xf32>
    %19 = vector.extract_strided_slice %9 {offsets = [0, 96], sizes = [2, 32], strides = [1, 1]} : vector<2x128xf32> to vector<2x32xf32>
    %20 = math.tanh %19 : vector<2x32xf32>
    %c0_11 = arith.constant 0 : index
    %c0_12 = arith.constant 0 : index
    %21 = vector.load %arg2[%c0_11, %c0_12] : memref<2x32xf32, #tpu.memory_space<vmem>>, vector<2x32xf32>
    %22 = arith.mulf %17, %21 : vector<2x32xf32>
    %23 = arith.mulf %16, %20 : vector<2x32xf32>
    %24 = arith.addf %22, %23 : vector<2x32xf32>
    %25 = math.tanh %24 : vector<2x32xf32>
    %26 = arith.mulf %18, %25 : vector<2x32xf32>
    %c0_13 = arith.constant 0 : index
    %c0_14 = arith.constant 0 : index
    %27 = vector.load %arg6[%c0_13, %c0_14] : memref<2x32xf32, #tpu.memory_space<vmem>>, vector<2x32xf32>
    tpu.vector_store %arg6[%c0_13, %c0_14], %26 {strides = array<i32>} : memref<2x32xf32, #tpu.memory_space<vmem>>, vector<2x32xf32>,
    %c0_15 = arith.constant 0 : index
    %c0_16 = arith.constant 0 : index
    %28 = vector.load %arg7[%c0_15, %c0_16] : memref<2x32xf32, #tpu.memory_space<vmem>>, vector<2x32xf32>
    tpu.vector_store %arg7[%c0_15, %c0_16], %24 {strides = array<i32>} : memref<2x32xf32, #tpu.memory_space<vmem>>, vector<2x32xf32>,
    return
  }
}

</mosaic_0001>

<bundles_post_ra>
// kernel: tpu_custom_call.1
= control target key start
LH: loop header
LB: loop body
LE: loop exit
PB: predicated region body
PF: predicated region fallthrough
CT: control target
= control target key end

     0   :  { %13 = vsyncpa [#allocation3], 0  ;;  %s608_s0 = inlined_call_operand.hbm [shape: f32[2,16], index: 0, kind: input, shape index: {}]   ;;  %s609_s1 = inlined_call_operand.vmem [shape: f32[2,32], index: 1, kind: input, shape index: {}]   ;;  %s610_s2 = inlined_call_operand.vmem [shape: f32[2,32], index: 2, kind: input, shape index: {}]   ;;  %s611_s3 = inlined_call_operand.hbm [shape: f32[16,128], index: 3, kind: input, shape index: {}]   ;;  %s612_s4 = inlined_call_operand.hbm [shape: f32[32,128], index: 4, kind: input, shape index: {}]   ;;  %s613_s5 = inlined_call_operand.vmem [shape: f32[1,128], index: 5, kind: input, shape index: {}]   ;;  %s614_s6 = inlined_call_operand.hbm [shape: f32[2,32], index: 6, kind: output, shape index: {0}]   ;;  %s615_s7 = inlined_call_operand.hbm [shape: f32[2,32], index: 7, kind: output, shape index: {1}]  }
   0x1   :  { %14 = vsyncpa [#allocation6], 0 }
   0x2   :  { %15 = vsyncpa [#allocation4], 0 }
   0x3   :  { %16 = vsyncpa [#allocation10], 0  ;;  %s478_s24 = smov [#allocation5]   ;;  %s360_s28 = scalar_lea.hbm %s611_s3, 256 }
   0x4   :  { %s36_s25 = sshll.u32 %s478_s24, 4  ;;  %p361_p0 = scmp.ne.s32.totalorder %s611_s3, %s360_s28  ;;  %s37_s25 = int_to_ptr.vmem [resolvable:$true] %s36_s25 }
   0x5   :  { %p364_p1 = scmp.lt.u32.totalorder %s360_s28, %s611_s3 }
   0x7   :  { %p366_p2 = pnand %p364_p1, %p361_p0 }
   0x9   :  { %369 = shalt.err (!%p366_p2)
}
   0xa   :  { %s370_s10 = scalar_lea.vmem %s37_s25, 256  ;;  %p375_p4 = scmp.lt.s32.totalorder %s37_s25, %s37_s25 }
   0xb   :  { %p371_p3 = scmp.ne.s32.totalorder %s37_s25, %s370_s10  ;;  %p376_p5 = scmp.lt.s32.totalorder %s370_s10, %s370_s10 }
   0xd   :  { %p377_p6 = por %p376_p5, %p375_p4 }
   0xf   :  { %p378_p7 = pnand %p377_p6, %p371_p3 }
  0x11   :  { %381 = shalt.err (!%p378_p7)
}
  0x12   :  { %s479_s11 = smov 128   ;;  %s480_s12 = smov 8  }
  0x13   :  { %42 = dma.hbm_to_vmem [thread:$0]  %s611_s3, 256, %s37_s25, [#allocation6], %s479_s11, %s479_s11, %s480_s12  }
  0x14   :  { %s481_s15 = smov [#allocation2]   ;;  %s482_s17 = smov [#allocation7]  }
  0x15   :  { %s23_s16 = sshll.u32 %s481_s15, 4  ;;  %s48_s18 = sshll.u32 %s482_s17, 4  ;;  %s24_s16 = int_to_ptr.vmem [resolvable:$true] %s23_s16  ;;  %s49_s18 = int_to_ptr.vmem [resolvable:$true] %s48_s18 }
  0x16   :  { %s382_s21 = scalar_lea.hbm %s608_s0, 32 }
  0x17   :  { %p383_p8 = scmp.ne.s32.totalorder %s608_s0, %s382_s21  ;;  %p386_p9 = scmp.lt.u32.totalorder %s382_s21, %s608_s0 }
  0x19   :  { %p388_p10 = pnand %p386_p9, %p383_p8 }
  0x1b   :  { %391 = shalt.err (!%p388_p10)
}
  0x1c   :  { %s392_s3 = scalar_lea.vmem %s24_s16, 32  ;;  %p397_p12 = scmp.lt.s32.totalorder %s24_s16, %s24_s16 }
  0x1d   :  { %p393_p11 = scmp.ne.s32.totalorder %s24_s16, %s392_s3  ;;  %p398_p13 = scmp.lt.s32.totalorder %s392_s3, %s392_s3 }
  0x1f   :  { %p399_p0 = por %p398_p13, %p397_p12 }
  0x21   :  { %p400_p1 = pnand %p399_p0, %p393_p11 }
  0x23   :  { %403 = shalt.err (!%p400_p1)
}
  0x24   :  { %26 = dma.hbm_to_vmem [thread:$0]  %s608_s0, 32, %s24_s16, [#allocation3]  }
  0x25   :  { %s404_s30 = scalar_lea.hbm %s612_s4, 512 }
  0x26   :  { %p405_p2 = scmp.ne.s32.totalorder %s612_s4, %s404_s30  ;;  %p408_p3 = scmp.lt.u32.totalorder %s404_s30, %s612_s4 }
  0x28   :  { %p410_p4 = pnand %p408_p3, %p405_p2 }
  0x2a   :  { %413 = shalt.err (!%p410_p4)
}
  0x2b   :  { %s414_s14 = scalar_lea.vmem %s49_s18, 512  ;;  %p419_p6 = scmp.lt.s32.totalorder %s49_s18, %s49_s18 }
  0x2c   :  { %p415_p5 = scmp.ne.s32.totalorder %s49_s18, %s414_s14  ;;  %p420_p7 = scmp.lt.s32.totalorder %s414_s14, %s414_s14 }
  0x2e   :  { %p421_p8 = por %p420_p7, %p419_p6 }
  0x30   :  { %p422_p9 = pnand %p421_p8, %p415_p5 }
  0x32   :  { %425 = shalt.err (!%p422_p9)
}
  0x33   :  { %54 = dma.hbm_to_vmem [thread:$0]  %s612_s4, 512, %s49_s18, [#allocation6], %s479_s11, %s479_s11, %s480_s12  }
  0x34   :  { %470 = dma.done.wait [#allocation3], 32  }
  0x35   :  { %471 = vsyncadd [#allocation3], 4294967264 }
  0x36   :  { %472 = dma.done.wait [#allocation6], 768  }
  0x37   :  { %473 = vsyncadd [#allocation6], 4294966528  ;;  %v483_v0 = vmov 0.0|0.0   ;;  %vm484_vm0 = vmmov 0   ;;  %v485_v1 = vmov 0.0   ;;  %v70_v2 = vld [vmem:[#allocation7] sm:$0xff] }
  0x38   :  { %330 = vmatprep.subr.bf16.mxu0 %v483_v0  ;;  %336 = vmatprep.subr.bf16.mxu1 %v483_v0  ;;  %v71_v3 = vld [vmem:[#allocation7 + $0x8] sm:$0xff]  ;;  %v67_v4 = vld [vmem:[#allocation5] sm:$0xff]  ;;  %v68_v6 = vld [vmem:[#allocation5 + $0x8] sm:$0xff]  ;;  %vm148_vm1 = vcmask 130048   ;;  %vm74_vm2 = vcmask 261120   ;;  %s486_s17 = smov 32  }
  0x39   :  { %327 = vmatprep.mubr.msk.f32.mxu1 %vm484_vm0, %v485_v1  ;;  %320 = vmatprep.mubr.msk.f32.mxu0 %vm484_vm0, %v485_v1  ;;  %v331_v5 = vpack.c.bf16 %v71_v3, %v70_v2  ;;  %v72_v7 = vld [vmem:[#allocation7 + $0x10] sm:$0xff]  ;;  %v73_v8 = vld [vmem:[#allocation7 + $0x18] sm:$0xff]  ;;  %v337_v9 = vpack.c.bf16 %v68_v6, %v67_v4  ;;  %v66_v11 = vld [vmem:[#allocation2] sm:$0x3]  ;;  %vm263_vm3 = vcmask 254976   ;;  %s489_s20 = smov 64  }
  0x3a   :  { %v334_v10 = vpack.c.bf16 %v73_v8, %v72_v7  ;;  %v69_v12 = vld [vmem:[%s609_s1] sm:$0x3]  ;;  %s487_s1 = smov 96  }
  0x3b   :  { %332 = vmatpush3.bf16.msra.mxu0 %v331_v5  ;;  %338 = vmatpush3.bf16.msra.mxu1 %v337_v9  ;;  %v302_v16 = vld [vmem:[%s613_s5] ss:$0 sm:$0xff] }
  0x3c   :  { %333 = vmatprep.subr.bf16.mxu0 %v483_v0  ;;  %v237_v21 = vld [vmem:[%s610_s2] sm:$0x3]  ;;  %s488_s2 = smov [#allocation9]  }
  0x3d   :  { %s286_s5 = sshll.u32 %s488_s2, 4  ;;  %s287_s5 = int_to_ptr.vmem [resolvable:$true] %s286_s5 }
  0x3e   :  { %328 = vmatmul.mubr.msk.f32.vlgmr.msra.gmra.mrb[0].mxu1 %vm148_vm1, %v66_v11  ;;  %s426_s21 = scalar_lea.vmem %s287_s5, 32  ;;  %p431_p11 = scmp.lt.s32.totalorder %s287_s5, %s287_s5 }
  0x3f   :  { %335 = vmatpush3.bf16.msra.mxu0 %v334_v10  ;;  %p427_p10 = scmp.ne.s32.totalorder %s287_s5, %s426_s21  ;;  %p432_p12 = scmp.lt.s32.totalorder %s426_s21, %s426_s21 }
  0x41   :  { %p433_p13 = por %p432_p12, %p431_p11 }
  0x42   :  { %321 = vmatmul.mubr.msk.f32.vlgmr.msra.gmra.mrb[0].mxu0 %vm74_vm2, %v69_v12 }
  0x43   :  { %p434_p0 = pnand %p433_p13, %p427_p10 }
 0x111   :  { %v218_v13 = vpop.f32.mrb[0].mxu1 }
 0x112   :  { %v329_v14 = vpop.f32.mrb[1].mxu1 }
 0x115   :  { %v144_v15 = vpop.f32.mrb[0].mxu0 }
 0x116   :  { %v219_v17 = vadd.f32 %v218_v13, %v144_v15  ;;  %v322_v18 = vpop.f32.mrb[1].mxu0 }
 0x118   :  { %v229_v19 = vadd.f32 %v302_v16, %v219_v17 }
 0x11a   :  { %352 = vtanh.f32 %v229_v19  ;;  %v303_v22 = vmul.f32 -1.442695, %v229_v19 }
 0x11c   :  { %354 = vpow2.f32 %v303_v22 }
 0x124   :  { %v353_v20 = vpop.eup %352 }
 0x125   :  { %244 = vrot.lane.b32.xlu0 %v353_v20, %s486_s17 }
 0x126   :  { %v355_v23 = vpop.eup %354 }
 0x127   :  { %v233_v24 = vadd.f32 1.0, %v355_v23 }
 0x129   :  { %239 = vrot.lane.b32.xlu0 %v237_v21, %s486_s17  ;;  %356 = vrcp.f32 %v233_v24 }
 0x133   :  { %v357_v25 = vpop.eup %356 }
 0x197   :  { %v245_v26 = vpop.permute.xlu0 %244 }
 0x198   :  { %v247_v27 = vmul.f32 %v357_v25, %v245_v26 }
 0x19a   :  { %249 = vrot.lane.b32.xlu1 %v247_v27, %s486_s17 }
 0x19b   :  { %v240_v28 = vpop.permute.xlu0 %239 }
 0x19c   :  { %v242_v29 = vmul.f32 %v357_v25, %v240_v28 }
 0x20c   :  { %v250_v30 = vpop.permute.xlu1 %249 }
 0x20d   :  { %v252_v31 = vadd.f32 %v250_v30, %v242_v29 }
 0x20f   :  { %358 = vtanh.f32 %v252_v31 }
 0x219   :  { %v359_v32 = vpop.eup %358 }
 0x21a   :  { %255 = vrot.lane.b32.xlu1 %v359_v32, %s486_s17 }
 0x21e   :  { %266 = vrot.lane.b32.xlu1 %v252_v31, %s487_s1 }
 0x28c   :  { %v256_v33 = vpop.permute.xlu1 %255 }
 0x28d   :  { %v258_v34 = vmul.f32 %v357_v25, %v256_v33 }
 0x28f   :  { %260 = vrot.lane.b32.xlu0 %v258_v34, %s489_s20 }
 0x290   :  { %v267_v35 = vpop.permute.xlu1 %266 }
 0x291   :  { %269 = vst.msk [vmem:[#allocation9] sm:$0x3] %vm263_vm3, %v267_v35 }
 0x292   :  { %437 = shalt.err (!%p434_p0)
}
 0x293   :  { %s438_s24 = scalar_lea.hbm %s615_s7, 32 }
 0x294   :  { %p439_p1 = scmp.ne.s32.totalorder %s615_s7, %s438_s24  ;;  %p442_p2 = scmp.lt.u32.totalorder %s438_s24, %s615_s7 }
 0x296   :  { %p444_p3 = pnand %p442_p2, %p439_p1 }
 0x298   :  { %447 = shalt.err (!%p444_p3)
}
 0x299   :  { %289 = dma.vmem_to_hbm [thread:$0]  %s287_s5, 32, %s615_s7, [#allocation10]  }
 0x29a   :  { %s490_s30 = smov [#allocation8]  }
 0x29b   :  { %s276_s8 = sshll.u32 %s490_s30, 4  ;;  %s277_s8 = int_to_ptr.vmem [resolvable:$true] %s276_s8 }
 0x29c   :  { %s448_s9 = scalar_lea.vmem %s277_s8, 32  ;;  %p453_p5 = scmp.lt.s32.totalorder %s277_s8, %s277_s8 }
 0x29d   :  { %p449_p4 = scmp.ne.s32.totalorder %s277_s8, %s448_s9  ;;  %p454_p6 = scmp.lt.s32.totalorder %s448_s9, %s448_s9 }
 0x29f   :  { %p455_p7 = por %p454_p6, %p453_p5 }
 0x2a1   :  { %p456_p8 = pnand %p455_p7, %p449_p4 }
 0x301   :  { %v261_v36 = vpop.permute.xlu0 %260 }
 0x302   :  { %264 = vst.msk [vmem:[#allocation8] sm:$0x3] %vm263_vm3, %v261_v36 }
 0x303   :  { %459 = shalt.err (!%p456_p8)
}
 0x304   :  { %s460_s14 = scalar_lea.hbm %s614_s6, 32 }
 0x305   :  { %p461_p9 = scmp.ne.s32.totalorder %s614_s6, %s460_s14  ;;  %p464_p10 = scmp.lt.u32.totalorder %s460_s14, %s614_s6 }
 0x307   :  { %p466_p11 = pnand %p464_p10, %p461_p9 }
 0x309   :  { %469 = shalt.err (!%p466_p11)
}
 0x30a   :  { %279 = dma.vmem_to_hbm [thread:$0]  %s277_s8, 32, %s614_s6, [#allocation4]  }
 0x30b   :  { %474 = dma.done.wait [#allocation4], 32  }
 0x30c   :  { %475 = vsyncadd [#allocation4], 4294967264 }
 0x30d   :  { %476 = dma.done.wait [#allocation10], 32  }
 0x30e   :  { %477 = vsyncadd [#allocation10], 4294967264 }
 0x30f   :  { %296 = vsyncpa [#allocation3], 1 }
 0x310   :  { %297 = vsyncpa [#allocation6], 1 }
 0x311   :  { %298 = vsyncpa [#allocation4], 1 }
 0x312   :  { %299 = vsyncpa [#allocation10], 1 }

</bundles_post_ra>
